<compile_context>
chip_gen: v5e
topology: v5e:2x2
jax: 0.10.0
libtpu: 0.0.40
codegen_flags: <defaults>
</compile_context>

<pallas_src>
import functools

import jax
import jax.numpy as jnp
from jax import lax
from jax.experimental import pallas as pl
from jax.experimental.pallas import tpu as pltpu


def _layernorm_kernel(x_ref, a_ref, b_ref, o_ref, *, eps, feat):
    # x_ref: (block_rows, feat)   a_ref/b_ref: (1, feat) f32   o_ref: (block_rows, feat)
    x = x_ref[...].astype(jnp.float32)

    # One-pass statistics: the two reductions are independent (XLU overlap).
    s = jnp.sum(x, axis=-1, keepdims=True)
    sq = jnp.sum(x * x, axis=-1, keepdims=True)
    mean = s * (1.0 / feat)

    # torch.std default is the UNBIASED estimator (ddof=1); std**2 == var(ddof=1).
    # NOTE: feat == 1 gives NaN in torch; we only guard the python-level divide.
    ddof_denom = float(feat - 1) if feat > 1 else 1.0
    var = (sq - s * mean) * (1.0 / ddof_denom)
    var = jnp.maximum(var, 0.0)               # guard tiny negative from rounding
    inv = lax.rsqrt(var + eps)                # EUP slot -> overlaps with VPU work

    xn = (x - mean) * inv                     # full-tile sub + mul
    y = xn * a_ref[...] + b_ref[...]          # full-tile mul + add
    o_ref[...] = y.astype(o_ref.dtype)


def _pick_block_rows(rows, feat, dtype_bytes,
                     target_block_bytes=8 * 1024 * 1024, max_rows=2048):
    """Largest row tile (multiple of the sublane packing) within a VMEM budget."""
    mult = 8 if dtype_bytes >= 4 else (16 if dtype_bytes == 2 else 32)
    br = target_block_bytes // max(1, feat * dtype_bytes)
    br = max(mult, min(max_rows, br))
    br = (br // mult) * mult
    rows_up = ((rows + mult - 1) // mult) * mult  # no point exceeding total rows
    return max(mult, min(br, rows_up))


def layer_norm_pallas(x, a_2, b_2, eps=1e-6, block_rows=None):
    """LayerNorm over the last axis, matching the PyTorch module's forward."""
    orig_shape = x.shape
    feat = orig_shape[-1]
    x2d = x.reshape(-1, feat)
    rows = x2d.shape[0]
    dtype_bytes = jnp.dtype(x.dtype).itemsize

    if block_rows is None:
        block_rows = _pick_block_rows(rows, feat, dtype_bytes)

    grid = pl.cdiv(rows, block_rows)  # ragged last block handled by Pallas masking

    # Cast / reshape params once here (not per grid step in the kernel).
    a2d = a_2.reshape(1, feat).astype(jnp.float32)
    b2d = b_2.reshape(1, feat).astype(jnp.float32)

    # Double-buffered in + out blocks (+ params + slack); capped so it also fits
    # v7x's 64 MiB physical VMEM.
    block_bytes = block_rows * feat * dtype_bytes
    vmem_limit = int(min(48 * 1024 * 1024,
                         max(32 * 1024 * 1024, 4 * block_bytes + (4 << 20))))

    cost = pl.CostEstimate(
        flops=8 * rows * feat,
        transcendentals=rows,
        bytes_accessed=2 * rows * feat * dtype_bytes + 8 * feat,
    )

    kernel = functools.partial(_layernorm_kernel, eps=float(eps), feat=feat)

    out = pl.pallas_call(
        kernel,
        out_shape=jax.ShapeDtypeStruct((rows, feat), x.dtype),
        grid_spec=pltpu.PrefetchScalarGridSpec(
            num_scalar_prefetch=0,
            grid=(grid,),
            in_specs=[
                pl.BlockSpec((block_rows, feat), lambda i: (i, 0)),
                pl.BlockSpec((1, feat), lambda i: (0, 0)),
                pl.BlockSpec((1, feat), lambda i: (0, 0)),
            ],
            out_specs=pl.BlockSpec((block_rows, feat), lambda i: (i, 0)),
        ),
        compiler_params=pltpu.CompilerParams(
            dimension_semantics=("parallel",),  # rows split across TCs (v7x megacore)
            vmem_limit_bytes=vmem_limit,
        ),
        cost_estimate=cost,
    )(x2d, a2d, b2d)

    return out.reshape(orig_shape)


def layer_norm_ref(x, a_2, b_2, eps=1e-6):
    xf = x.astype(jnp.float32)
    mean = jnp.mean(xf, axis=-1, keepdims=True)
    std = jnp.std(xf, axis=-1, keepdims=True, ddof=1)  # torch unbiased std
    return (a_2 * (xf - mean) / jnp.sqrt(std**2 + eps) + b_2).astype(x.dtype)


if __name__ == "__main__":
    key = jax.random.PRNGKey(0)

    # Shapes implied by the module: (..., features) with features last.
    batch, seq, hidden = 2, 8, 32
    x = jax.random.normal(key, (batch, seq, hidden), dtype=jnp.float32)

    # Parameters per __init__: a_2 = ones(features), b_2 = zeros(features);
    # use non-trivial values to exercise the affine path.
    k1, k2 = jax.random.split(key)
    a_2 = jnp.ones((hidden,), dtype=jnp.float32) + 0.1 * jax.random.normal(k1, (hidden,))
    b_2 = 0.1 * jax.random.normal(k2, (hidden,), dtype=jnp.float32)

    out = layer_norm_pallas(x, a_2, b_2, eps=1e-6)
    out = jax.block_until_ready(out)
    ref = layer_norm_ref(x, a_2, b_2, eps=1e-6)
    assert out.shape == x.shape and out.dtype == x.dtype
    assert jnp.allclose(out, ref, atol=1e-5, rtol=1e-5)

    # Ragged case: rows not a multiple of block_rows (exercises padding-free path).
    x_ragged = jax.random.normal(k1, (3, 5, hidden), dtype=jnp.float32)
    out_r = jax.block_until_ready(layer_norm_pallas(x_ragged, a_2, b_2, eps=1e-6))
    ref_r = layer_norm_ref(x_ragged, a_2, b_2, eps=1e-6)
    assert jnp.allclose(out_r, ref_r, atol=1e-5, rtol=1e-5)

    print("KERNEL_OK")
</pallas_src>

<mosaic_0001>
module attributes {stable_mosaic.version = 11 : i64} {
  func.func @_layernorm_kernel(%arg0: i32, %arg1: memref<16x32xf32, #tpu.memory_space<vmem>>, %arg2: memref<1x32xf32, #tpu.memory_space<vmem>>, %arg3: memref<1x32xf32, #tpu.memory_space<vmem>>, %arg4: memref<16x32xf32, #tpu.memory_space<vmem>>) attributes {dimension_semantics = [#tpu.dimension_semantics<parallel>], iteration_bounds = array<i64: 1>, scalar_prefetch = 0 : i64, scratch_operands = 0 : i64, tpu.core_type = #tpu.core_type<tc>, window_params = [{transform_indices = @transform_0, window_bounds = array<i64: 16, 32>}, {pipeline_mode = #tpu.pipeline_mode<synchronous>, transform_indices = @transform_1, window_bounds = array<i64: 1, 32>}, {pipeline_mode = #tpu.pipeline_mode<synchronous>, transform_indices = @transform_2, window_bounds = array<i64: 1, 32>}, {transform_indices = @transform_3, window_bounds = array<i64: 16, 32>}]} {
    %c0 = arith.constant 0 : index
    %c0_0 = arith.constant 0 : index
    %0 = vector.load %arg1[%c0, %c0_0] : memref<16x32xf32, #tpu.memory_space<vmem>>, vector<16x32xf32>
    %cst = arith.constant dense<0.000000e+00> : vector<16xf32>
    %1 = vector.multi_reduction <add>, %0, %cst [1] : vector<16x32xf32> to vector<16xf32>
    %2 = vector.shape_cast %1 : vector<16xf32> to vector<16x1xf32>
    %3 = arith.mulf %0, %0 : vector<16x32xf32>
    %cst_1 = arith.constant dense<0.000000e+00> : vector<16xf32>
    %4 = vector.multi_reduction <add>, %3, %cst_1 [1] : vector<16x32xf32> to vector<16xf32>
    %5 = vector.shape_cast %4 : vector<16xf32> to vector<16x1xf32>
    %cst_2 = arith.constant 3.125000e-02 : f32
    %6 = vector.broadcast %cst_2 : f32 to vector<16x1xf32>
    %7 = arith.mulf %2, %6 : vector<16x1xf32>
    %8 = arith.mulf %2, %7 : vector<16x1xf32>
    %9 = arith.subf %5, %8 : vector<16x1xf32>
    %cst_3 = arith.constant 0.0322580636 : f32
    %10 = vector.broadcast %cst_3 : f32 to vector<16x1xf32>
    %11 = arith.mulf %9, %10 : vector<16x1xf32>
    %cst_4 = arith.constant 0.000000e+00 : f32
    %12 = vector.broadcast %cst_4 : f32 to vector<16x1xf32>
    %13 = arith.maximumf %11, %12 : vector<16x1xf32>
    %cst_5 = arith.constant 9.99999997E-7 : f32
    %14 = vector.broadcast %cst_5 : f32 to vector<16x1xf32>
    %15 = arith.addf %13, %14 : vector<16x1xf32>
    %16 = math.rsqrt %15 : vector<16x1xf32>
    %17 = vector.broadcast %7 : vector<16x1xf32> to vector<16x32xf32>
    %18 = arith.subf %0, %17 : vector<16x32xf32>
    %19 = vector.broadcast %16 : vector<16x1xf32> to vector<16x32xf32>
    %20 = arith.mulf %18, %19 : vector<16x32xf32>
    %c0_6 = arith.constant 0 : index
    %c0_7 = arith.constant 0 : index
    %21 = vector.load %arg2[%c0_6, %c0_7] : memref<1x32xf32, #tpu.memory_space<vmem>>, vector<1x32xf32>
    %22 = vector.broadcast %21 : vector<1x32xf32> to vector<16x32xf32>
    %23 = arith.mulf %20, %22 : vector<16x32xf32>
    %c0_8 = arith.constant 0 : index
    %c0_9 = arith.constant 0 : index
    %24 = vector.load %arg3[%c0_8, %c0_9] : memref<1x32xf32, #tpu.memory_space<vmem>>, vector<1x32xf32>
    %25 = vector.broadcast %24 : vector<1x32xf32> to vector<16x32xf32>
    %26 = arith.addf %23, %25 : vector<16x32xf32>
    %c0_10 = arith.constant 0 : index
    %c0_11 = arith.constant 0 : index
    %27 = vector.load %arg4[%c0_10, %c0_11] : memref<16x32xf32, #tpu.memory_space<vmem>>, vector<16x32xf32>
    tpu.vector_store %arg4[%c0_10, %c0_11], %26 {strides = array<i32>} : memref<16x32xf32, #tpu.memory_space<vmem>>, vector<16x32xf32>,
    return
  }
  func.func @transform_0(%arg0: i32) -> (i32, i32) {
    %c0_i32 = arith.constant 0 : i32
    %c0_i32_0 = arith.constant 0 : i32
    return %arg0, %c0_i32 : i32, i32
  }
  func.func @transform_1(%arg0: i32) -> (i32, i32) {
    %c0_i32 = arith.constant 0 : i32
    %c0_i32_0 = arith.constant 0 : i32
    %c0_i32_1 = arith.constant 0 : i32
    return %c0_i32, %c0_i32_0 : i32, i32
  }
  func.func @transform_2(%arg0: i32) -> (i32, i32) {
    %c0_i32 = arith.constant 0 : i32
    %c0_i32_0 = arith.constant 0 : i32
    %c0_i32_1 = arith.constant 0 : i32
    return %c0_i32, %c0_i32_0 : i32, i32
  }
  func.func @transform_3(%arg0: i32) -> (i32, i32) {
    %c0_i32 = arith.constant 0 : i32
    %c0_i32_0 = arith.constant 0 : i32
    return %arg0, %c0_i32 : i32, i32
  }
}

</mosaic_0001>

<bundles_post_ra>
// kernel: tpu_custom_call.1
= control target key start
LH: loop header
LB: loop body
LE: loop exit
PB: predicated region body
PF: predicated region fallthrough
CT: control target
= control target key end

     0   :  { %8 = vsyncpa [#allocation3], 0  ;;  %s270_s0 = inlined_call_operand.hbm [shape: f32[16,32], index: 0, kind: input, shape index: {}]   ;;  %s271_s1 = inlined_call_operand.hbm [shape: f32[1,32], index: 1, kind: input, shape index: {}]   ;;  %s272_s2 = inlined_call_operand.vmem [shape: f32[1,32], index: 2, kind: input, shape index: {}]   ;;  %s273_s3 = inlined_call_operand.hbm [shape: f32[16,32], index: 3, kind: output, shape index: {}]  }
   0x1   :  { %9 = vsyncpa [#allocation6], 0 }
   0x2   :  { %10 = vsyncpa [#allocation4], 0  ;;  %s15_s14 = sshll.u32 %s270_s0, 4  ;;  %s221_s15 = smov [#allocation2]   ;;  %s16_s14 = int_to_ptr.hbm [resolvable:$true] %s15_s14 }
   0x3   :  { %s17_s16 = sshll.u32 %s221_s15, 4  ;;  %s29_s19 = sshll.u32 %s271_s1, 4  ;;  %s18_s16 = int_to_ptr.vmem [resolvable:$true] %s17_s16  ;;  %s30_s19 = int_to_ptr.hbm [resolvable:$true] %s29_s19 }
   0x4   :  { %s222_s20 = smov 128   ;;  %s223_s21 = smov 8  }
   0x5   :  { %23 = dma.hbm_to_vmem [thread:$0]  %s16_s14, 256, %s18_s16, [#allocation3], %s222_s20, %s222_s20, %s223_s21  }
   0x6   :  { %s224_s22 = smov [#allocation5]  }
   0x7   :  { %s31_s23 = sshll.u32 %s224_s22, 4  ;;  %s32_s23 = int_to_ptr.vmem [resolvable:$true] %s31_s23 }
   0x8   :  { %34 = dma.hbm_to_vmem [thread:$0]  %s30_s19, 16, %s32_s23, [#allocation6]  }
   0x9   :  { %215 = dma.done.wait [#allocation3], 256  }
   0xa   :  { %216 = vsyncadd [#allocation3], 4294967040 }
   0xb   :  { %217 = dma.done.wait [#allocation6], 16  }
   0xc   :  { %218 = vsyncadd [#allocation6], 4294967280  ;;  %vm47_vm0 = vcmask 261120   ;;  %v45_v0 = vld [vmem:[#allocation2] sm:$0xff]  ;;  %v46_v4 = vld [vmem:[#allocation2 + $0x8] sm:$0xff]  ;;  %s225_s24 = smov [#allocation7]  }
   0xd   :  { %v48_v1 = vsel %vm47_vm0, %v45_v0, 0.0  ;;  %v54_v2 = vmul.f32 %v45_v0, %v45_v0  ;;  %v55_v5 = vmul.f32 %v46_v4, %v46_v4  ;;  %v51_v6 = vsel %vm47_vm0, %v46_v4, 0.0  ;;  %v137_v33 = vld [vmem:[#allocation5] ss:$0 sm:$0xff]  ;;  %v138_v37 = vld [vmem:[%s272_s2] ss:$0 sm:$0xff] }
   0xe   :  { %49 = vadd.xlane.f32.xlu0 %v48_v1  ;;  %s116_s25 = sshll.u32 %s225_s24, 4  ;;  %s118_s28 = sshll.u32 %s273_s3, 4  ;;  %s117_s25 = int_to_ptr.vmem [resolvable:$true] %s116_s25  ;;  %s119_s28 = int_to_ptr.hbm [resolvable:$true] %s118_s28 }
   0xf   :  { %v56_v3 = vsel %vm47_vm0, %v54_v2, 0.0  ;;  %v59_v7 = vsel %vm47_vm0, %v55_v5, 0.0 }
  0x10   :  { %57 = vadd.xlane.f32.xlu1 %v56_v3 }
  0x16   :  { %52 = vadd.xlane.f32.xlu0 %v51_v6 }
  0x18   :  { %60 = vadd.xlane.f32.xlu1 %v59_v7 }
  0x81   :  { %v50_v8 = vpop.xlane.xlu0 %49 }
  0x82   :  { %v62_v9 = vmul.f32 0.03125, %v50_v8 }
  0x83   :  { %v58_v10 = vpop.xlane.xlu1 %57 }
  0x84   :  { %v64_v11 = vmul.f32 %v62_v9, %v50_v8  ;;  %v94_v32 = vsub.f32 %v45_v0, %v62_v9 }
  0x86   :  { %v66_v12 = vsub.f32 %v58_v10, %v64_v11 }
  0x88   :  { %v68_v13 = vmul.f32 0.032258064, %v66_v12 }
  0x89   :  { %v53_v14 = vpop.xlane.xlu0 %52 }
  0x8a   :  { %v70_v15 = vmax.f32 %v68_v13, 0.0  ;;  %v63_v16 = vmul.f32 0.03125, %v53_v14 }
  0x8b   :  { %v61_v17 = vpop.xlane.xlu1 %60 }
  0x8c   :  { %v72_v18 = vadd.f32 1e-06, %v70_v15  ;;  %v65_v19 = vmul.f32 %v63_v16, %v53_v14  ;;  %v95_v43 = vsub.f32 %v46_v4, %v63_v16 }
  0x8e   :  { %139 = vrsqrt.f32 %v72_v18  ;;  %v67_v20 = vsub.f32 %v61_v17, %v65_v19  ;;  %vm80_vm2 = vweird.f32 %v72_v18 }
  0x90   :  { %v69_v21 = vmul.f32 0.032258064, %v67_v20 }
  0x92   :  { %v71_v22 = vmax.f32 %v69_v21, 0.0 }
  0x94   :  { %v140_v23 = vpop.eup %139  ;;  %v73_v24 = vadd.f32 1e-06, %v71_v22 }
  0x95   :  { %v75_v25 = vmul.f32 %v140_v23, %v72_v18  ;;  %vm81_vm1 = vweird.f32 %v140_v23 }
  0x96   :  { %141 = vrsqrt.f32 %v73_v24  ;;  %vm82_vm3 = vmor %vm80_vm2, %vm81_vm1  ;;  %vm90_vm5 = vweird.f32 %v73_v24 }
  0x97   :  { %v76_v26 = vmul.f32 %v140_v23, %v75_v25 }
  0x99   :  { %v77_v27 = vmul.f32 0.5, %v76_v26 }
  0x9b   :  { %v78_v28 = vsub.f32 1.5, %v77_v27 }
  0x9c   :  { %v142_v29 = vpop.eup %141 }
  0x9d   :  { %v79_v30 = vmul.f32 %v140_v23, %v78_v28  ;;  %v85_v31 = vmul.f32 %v142_v29, %v73_v24  ;;  %vm91_vm4 = vweird.f32 %v142_v29 }
  0x9e   :  { %vm92_vm6 = vmor %vm90_vm5, %vm91_vm4 }
  0x9f   :  { %v83_v34 = vsel %vm82_vm3, %v140_v23, %v79_v30  ;;  %v86_v35 = vmul.f32 %v142_v29, %v85_v31 }
  0xa0   :  { %v96_v36 = vmul.f32 %v94_v32, %v83_v34 }
  0xa1   :  { %v87_v38 = vmul.f32 0.5, %v86_v35 }
  0xa2   :  { %v102_v39 = vmul.f32 %v137_v33, %v96_v36 }
  0xa3   :  { %v88_v40 = vsub.f32 1.5, %v87_v38 }
  0xa4   :  { %v108_v41 = vadd.f32 %v138_v37, %v102_v39 }
  0xa5   :  { %v89_v42 = vmul.f32 %v142_v29, %v88_v40 }
  0xa6   :  { %110 = vst.msk [vmem:[#allocation7] sm:$0xff] %vm47_vm0, %v108_v41 }
  0xa7   :  { %v93_v44 = vsel %vm92_vm6, %v142_v29, %v89_v42 }
  0xa8   :  { %v97_v45 = vmul.f32 %v95_v43, %v93_v44 }
  0xaa   :  { %v103_v46 = vmul.f32 %v137_v33, %v97_v45 }
  0xac   :  { %v109_v47 = vadd.f32 %v138_v37, %v103_v46 }
  0xae   :  { %111 = vst.msk [vmem:[#allocation7 + $0x8] sm:$0xff] %vm47_vm0, %v109_v47 }
  0xaf   :  { %124 = dma.vmem_to_hbm [thread:$0]  %s117_s25, 256, %s119_s28, [#allocation4], %s222_s20, %s222_s20, %s223_s21  }
  0xb0   :  { %219 = dma.done.wait [#allocation4], 256  }
  0xb1   :  { %220 = vsyncadd [#allocation4], 4294967040 }
  0xb2   :  { %129 = vsyncpa [#allocation3], 1 }
  0xb3   :  { %130 = vsyncpa [#allocation6], 1 }
  0xb4   :  { %131 = vsyncpa [#allocation4], 1 }

</bundles_post_ra>
